<compile_context>
chip_gen: v5e
topology: v5e:2x2
jax: 0.10.0
libtpu: 0.0.40
codegen_flags: <defaults>
</compile_context>

<pallas_src>
import functools

import jax
import jax.numpy as jnp
from jax.experimental import pallas as pl
from jax.experimental.pallas import tpu as pltpu
import numpy as np


def _up_conv_kernel(x_ref, w_ref, o_ref, col_ref, *, H, W, Cin, Cout, K_pad):
    # x_ref:   (Cin, (H+3)*(W+2))  original-res input, zero padded, flat spatial
    # w_ref:   (4*Cout, K_pad)     fused per-phase weights (+ bias column)
    # o_ref:   (4, Cout, H*(W+2))  phase-major output, pad columns kept
    # col_ref: (K_pad, H*(W+2))    write-once im2col scratch
    Wp = W + 2
    L = H * Wp
    xf = x_ref[...]

    # Build the im2col once: tap (oy, ox) is a static lane shift of oy*Wp + ox
    # along the flat spatial axis, written directly into its K-row block.
    for oy in range(3):
        for ox in range(3):
            off = oy * Wp + ox
            col_ref[pl.ds((oy * 3 + ox) * Cin, Cin), :] = xf[:, off:off + L]
    # Bias row (ones) + zero padding rows up to K_pad.
    col_ref[pl.ds(9 * Cin, 1), :] = jnp.ones((1, L), jnp.float32)
    if K_pad > 9 * Cin + 1:
        col_ref[pl.ds(9 * Cin + 1, K_pad - 9 * Cin - 1), :] = jnp.zeros(
            (K_pad - 9 * Cin - 1, L), jnp.float32)

    # One fused matmul: M = 4*Cout (all phases), K = K_pad, N = L (lane-dense).
    acc = jnp.dot(w_ref[...], col_ref[...],
                  preferred_element_type=jnp.float32)      # (4*Cout, L), bias included
    acc = jnp.where(acc >= 0, acc, 0.01 * acc)             # LeakyReLU, slope 0.01
    o_ref[...] = acc.reshape(4, Cout, L).astype(o_ref.dtype)


def _fold_fused_weight(w, b, K_pad):
    """w: (3,3,Cin,Cout), b: (Cout,) -> (4*Cout, K_pad) fused phase/tap weight.

    K layout: 9 taps (oy, ox) row-major, Cin entries each; then one bias
    column; then zero padding to K_pad.  Phase p = 2*py + px owns output rows
    [p*Cout, (p+1)*Cout).  Taps not used by a phase get zero columns.
    """
    Cin, Cout = w.shape[2], w.shape[3]
    groups = (((0,), (1, 2)), ((0, 1), (2,)))   # [py/px][tap] -> 3x3 kernel rows/cols
    zeros_tap = jnp.zeros((Cout, Cin), w.dtype)
    phase_rows = []
    for py in range(2):
        for px in range(2):
            cols = []
            for oy in range(3):
                for ox in range(3):
                    ty, tx = oy - py, ox - px
                    if 0 <= ty <= 1 and 0 <= tx <= 1:
                        ws = sum(w[dy, dx] for dy in groups[py][ty]
                                 for dx in groups[px][tx])
                        cols.append(ws.T)                              # (Cout, Cin)
                    else:
                        cols.append(zeros_tap)
            cols.append(b.reshape(Cout, 1).astype(w.dtype))            # bias column
            pad = K_pad - (9 * Cin + 1)
            if pad:
                cols.append(jnp.zeros((Cout, pad), w.dtype))
            phase_rows.append(jnp.concatenate(cols, axis=1))           # (Cout, K_pad)
    return jnp.concatenate(phase_rows, axis=0)                         # (4*Cout, K_pad)


@jax.jit
def up_conv_forward(x_nchw, w, b):
    """x_nchw: (N, Cin, H, W); w: (3, 3, Cin, Cout); b: (Cout,) -> (N, Cout, 2H, 2W)."""
    N, Cin, H, W = x_nchw.shape
    Cout = w.shape[-1]
    Wp = W + 2
    L = H * Wp
    FL = (H + 3) * Wp            # 1 top + 2 bottom rows, 1 left + 1 right cols of
                                 # zero pad (extra bottom row keeps every flat tap
                                 # window in bounds; its values are never used).
    K = 9 * Cin + 1              # 9 taps * Cin + bias row
    K_pad = -(-K // 8) * 8       # align K to f32 sublane packing

    x_pad = jnp.pad(x_nchw, ((0, 0), (0, 0), (1, 2), (1, 1)))   # (N, Cin, H+3, W+2)
    x_flat = x_pad.reshape(N, Cin, FL)                          # free contiguous reshape
    w_fused = _fold_fused_weight(w, b, K_pad)                   # (4*Cout, K_pad)

    cost = pl.CostEstimate(
        flops=2 * N * (4 * Cout) * K_pad * L,
        transcendentals=0,
        bytes_accessed=4 * (N * Cin * FL + 4 * Cout * K_pad + N * 4 * Cout * L))

    out_ph = pl.pallas_call(
        functools.partial(_up_conv_kernel, H=H, W=W, Cin=Cin, Cout=Cout,
                          K_pad=K_pad),
        out_shape=jax.ShapeDtypeStruct((N, 4, Cout, L), x_nchw.dtype),
        grid_spec=pltpu.PrefetchScalarGridSpec(
            num_scalar_prefetch=0,
            grid=(N,),
            in_specs=[
                pl.BlockSpec((None, Cin, FL), lambda n: (n, 0, 0)),
                pl.BlockSpec((4 * Cout, K_pad), lambda n: (0, 0)),
            ],
            out_specs=pl.BlockSpec((None, 4, Cout, L), lambda n: (n, 0, 0, 0)),
            scratch_shapes=[pltpu.VMEM((K_pad, L), jnp.float32)],
        ),
        compiler_params=pltpu.CompilerParams(
            dimension_semantics=("parallel",)),
        cost_estimate=cost,
    )(x_flat, w_fused)

    # Phase-major -> NCHW 2x2 interleave + pad-column drop, done on HBM in the
    # wrapper (keeps the kernel's stores lane-dense).
    out = out_ph.reshape(N, 2, 2, Cout, H, Wp)[..., :W]          # (N, py, px, C, H, W)
    out = out.transpose(0, 3, 4, 1, 5, 2).reshape(N, Cout, 2 * H, 2 * W)
    return out


def _reference(x_nchw, w, b):
    # Pure-JAX reference: explicit nearest-2x upsample + conv3x3 (pad 1) + bias + LeakyReLU.
    x_up = jnp.repeat(jnp.repeat(x_nchw, 2, axis=2), 2, axis=3)
    w_oihw = jnp.transpose(w, (3, 2, 0, 1))
    y = jax.lax.conv_general_dilated(
        x_up, w_oihw, window_strides=(1, 1), padding=((1, 1), (1, 1)),
        dimension_numbers=("NCHW", "OIHW", "NCHW"))
    y = y + b.reshape(1, -1, 1, 1)
    return jnp.where(y >= 0, y, 0.01 * y)


if __name__ == "__main__":
    key = jax.random.PRNGKey(0)
    k1, k2, k3 = jax.random.split(key, 3)

    N, Cin, H, W = 2, 4, 16, 16
    Cout = 8

    x = jax.random.normal(k1, (N, Cin, H, W), dtype=jnp.float32)
    w = (jax.random.normal(k2, (3, 3, Cin, Cout), dtype=jnp.float32)
         * (1.0 / np.sqrt(9 * Cin)))
    b = jax.random.normal(k3, (Cout,), dtype=jnp.float32) * 0.1

    out = up_conv_forward(x, w, b)
    jax.block_until_ready(out)

    ref = _reference(x, w, b)
    np.testing.assert_allclose(np.asarray(out), np.asarray(ref),
                               rtol=1e-4, atol=1e-4)

    print("KERNEL_OK")
</pallas_src>

<mosaic_0001>
module attributes {stable_mosaic.version = 11 : i64} {
  func.func @_up_conv_kernel(%arg0: i32, %arg1: memref<1x4x342xf32, #tpu.memory_space<vmem>>, %arg2: memref<32x40xf32, #tpu.memory_space<vmem>>, %arg3: memref<1x4x8x288xf32, #tpu.memory_space<vmem>>, %arg4: memref<40x288xf32, #tpu.memory_space<vmem>>) attributes {dimension_semantics = [#tpu.dimension_semantics<parallel>], iteration_bounds = array<i64: 2>, scalar_prefetch = 0 : i64, scratch_operands = 1 : i64, tpu.core_type = #tpu.core_type<tc>, window_params = [{transform_indices = @transform_0, window_bounds = array<i64: 1, 4, 342>}, {pipeline_mode = #tpu.pipeline_mode<synchronous>, transform_indices = @transform_1, window_bounds = array<i64: 32, 40>}, {transform_indices = @transform_2, window_bounds = array<i64: 1, 4, 8, 288>}]} {
    %c0 = arith.constant 0 : index
    %c0_0 = arith.constant 0 : index
    %c0_1 = arith.constant 0 : index
    %0 = vector.load %arg1[%c0, %c0_0, %c0_1] : memref<1x4x342xf32, #tpu.memory_space<vmem>>, vector<1x4x342xf32>
    %1 = vector.shape_cast %0 : vector<1x4x342xf32> to vector<4x342xf32>
    %2 = vector.extract_strided_slice %1 {offsets = [0, 0], sizes = [4, 288], strides = [1, 1]} : vector<4x342xf32> to vector<4x288xf32>
    %c0_2 = arith.constant 0 : index
    %c0_3 = arith.constant 0 : index
    %3 = vector.load %arg4[%c0_2, %c0_3] : memref<40x288xf32, #tpu.memory_space<vmem>>, vector<4x288xf32>
    tpu.vector_store %arg4[%c0_2, %c0_3], %2 {strides = array<i32>} : memref<40x288xf32, #tpu.memory_space<vmem>>, vector<4x288xf32>,
    %4 = vector.extract_strided_slice %1 {offsets = [0, 1], sizes = [4, 288], strides = [1, 1]} : vector<4x342xf32> to vector<4x288xf32>
    %c4 = arith.constant 4 : index
    %c0_4 = arith.constant 0 : index
    %5 = vector.load %arg4[%c4, %c0_4] : memref<40x288xf32, #tpu.memory_space<vmem>>, vector<4x288xf32>
    tpu.vector_store %arg4[%c4, %c0_4], %4 {strides = array<i32>} : memref<40x288xf32, #tpu.memory_space<vmem>>, vector<4x288xf32>,
    %6 = vector.extract_strided_slice %1 {offsets = [0, 2], sizes = [4, 288], strides = [1, 1]} : vector<4x342xf32> to vector<4x288xf32>
    %c8 = arith.constant 8 : index
    %c0_5 = arith.constant 0 : index
    %7 = vector.load %arg4[%c8, %c0_5] : memref<40x288xf32, #tpu.memory_space<vmem>>, vector<4x288xf32>
    tpu.vector_store %arg4[%c8, %c0_5], %6 {strides = array<i32>} : memref<40x288xf32, #tpu.memory_space<vmem>>, vector<4x288xf32>,
    %8 = vector.extract_strided_slice %1 {offsets = [0, 18], sizes = [4, 288], strides = [1, 1]} : vector<4x342xf32> to vector<4x288xf32>
    %c12 = arith.constant 12 : index
    %c0_6 = arith.constant 0 : index
    %9 = vector.load %arg4[%c12, %c0_6] : memref<40x288xf32, #tpu.memory_space<vmem>>, vector<4x288xf32>
    tpu.vector_store %arg4[%c12, %c0_6], %8 {strides = array<i32>} : memref<40x288xf32, #tpu.memory_space<vmem>>, vector<4x288xf32>,
    %10 = vector.extract_strided_slice %1 {offsets = [0, 19], sizes = [4, 288], strides = [1, 1]} : vector<4x342xf32> to vector<4x288xf32>
    %c16 = arith.constant 16 : index
    %c0_7 = arith.constant 0 : index
    %11 = vector.load %arg4[%c16, %c0_7] : memref<40x288xf32, #tpu.memory_space<vmem>>, vector<4x288xf32>
    tpu.vector_store %arg4[%c16, %c0_7], %10 {strides = array<i32>} : memref<40x288xf32, #tpu.memory_space<vmem>>, vector<4x288xf32>,
    %12 = vector.extract_strided_slice %1 {offsets = [0, 20], sizes = [4, 288], strides = [1, 1]} : vector<4x342xf32> to vector<4x288xf32>
    %c20 = arith.constant 20 : index
    %c0_8 = arith.constant 0 : index
    %13 = vector.load %arg4[%c20, %c0_8] : memref<40x288xf32, #tpu.memory_space<vmem>>, vector<4x288xf32>
    tpu.vector_store %arg4[%c20, %c0_8], %12 {strides = array<i32>} : memref<40x288xf32, #tpu.memory_space<vmem>>, vector<4x288xf32>,
    %14 = vector.extract_strided_slice %1 {offsets = [0, 36], sizes = [4, 288], strides = [1, 1]} : vector<4x342xf32> to vector<4x288xf32>
    %c24 = arith.constant 24 : index
    %c0_9 = arith.constant 0 : index
    %15 = vector.load %arg4[%c24, %c0_9] : memref<40x288xf32, #tpu.memory_space<vmem>>, vector<4x288xf32>
    tpu.vector_store %arg4[%c24, %c0_9], %14 {strides = array<i32>} : memref<40x288xf32, #tpu.memory_space<vmem>>, vector<4x288xf32>,
    %16 = vector.extract_strided_slice %1 {offsets = [0, 37], sizes = [4, 288], strides = [1, 1]} : vector<4x342xf32> to vector<4x288xf32>
    %c28 = arith.constant 28 : index
    %c0_10 = arith.constant 0 : index
    %17 = vector.load %arg4[%c28, %c0_10] : memref<40x288xf32, #tpu.memory_space<vmem>>, vector<4x288xf32>
    tpu.vector_store %arg4[%c28, %c0_10], %16 {strides = array<i32>} : memref<40x288xf32, #tpu.memory_space<vmem>>, vector<4x288xf32>,
    %18 = vector.extract_strided_slice %1 {offsets = [0, 38], sizes = [4, 288], strides = [1, 1]} : vector<4x342xf32> to vector<4x288xf32>
    %c32 = arith.constant 32 : index
    %c0_11 = arith.constant 0 : index
    %19 = vector.load %arg4[%c32, %c0_11] : memref<40x288xf32, #tpu.memory_space<vmem>>, vector<4x288xf32>
    tpu.vector_store %arg4[%c32, %c0_11], %18 {strides = array<i32>} : memref<40x288xf32, #tpu.memory_space<vmem>>, vector<4x288xf32>,
    %cst = arith.constant 1.000000e+00 : f32
    %20 = vector.broadcast %cst : f32 to vector<1x288xf32>
    %c36 = arith.constant 36 : index
    %c0_12 = arith.constant 0 : index
    %21 = vector.load %arg4[%c36, %c0_12] : memref<40x288xf32, #tpu.memory_space<vmem>>, vector<1x288xf32>
    tpu.vector_store %arg4[%c36, %c0_12], %20 {strides = array<i32>} : memref<40x288xf32, #tpu.memory_space<vmem>>, vector<1x288xf32>,
    %cst_13 = arith.constant 0.000000e+00 : f32
    %22 = vector.broadcast %cst_13 : f32 to vector<3x288xf32>
    %c37 = arith.constant 37 : index
    %c0_14 = arith.constant 0 : index
    %23 = vector.load %arg4[%c37, %c0_14] : memref<40x288xf32, #tpu.memory_space<vmem>>, vector<3x288xf32>
    tpu.vector_store %arg4[%c37, %c0_14], %22 {strides = array<i32>} : memref<40x288xf32, #tpu.memory_space<vmem>>, vector<3x288xf32>,
    %c0_15 = arith.constant 0 : index
    %c0_16 = arith.constant 0 : index
    %24 = vector.load %arg2[%c0_15, %c0_16] : memref<32x40xf32, #tpu.memory_space<vmem>>, vector<32x40xf32>
    %c0_17 = arith.constant 0 : index
    %c0_18 = arith.constant 0 : index
    %25 = vector.load %arg4[%c0_17, %c0_18] : memref<40x288xf32, #tpu.memory_space<vmem>>, vector<40x288xf32>
    %cst_19 = arith.constant dense<0.000000e+00> : vector<32x288xf32>
    %26 = tpu.matmul %24, %25, %cst_19 {dimension_numbers = #tpu.dot_dimension_numbers<[1], [0], [0], [1], [0, 0, 1, 1], [], []>} : vector<32x40xf32>, vector<40x288xf32>, vector<32x288xf32> -> vector<32x288xf32>
    %cst_20 = arith.constant 0.000000e+00 : f32
    %27 = vector.broadcast %cst_20 : f32 to vector<32x288xf32>
    %28 = arith.cmpf oge, %26, %27 : vector<32x288xf32>
    %cst_21 = arith.constant 0.00999999977 : f32
    %29 = vector.broadcast %cst_21 : f32 to vector<32x288xf32>
    %30 = arith.mulf %29, %26 : vector<32x288xf32>
    %31 = arith.select %28, %26, %30 : vector<32x288xi1>, vector<32x288xf32>
    %32 = vector.shape_cast %31 : vector<32x288xf32> to vector<4x8x288xf32>
    %c0_22 = arith.constant 0 : index
    %c0_23 = arith.constant 0 : index
    %c0_24 = arith.constant 0 : index
    %c0_25 = arith.constant 0 : index
    %33 = vector.load %arg3[%c0_22, %c0_23, %c0_24, %c0_25] : memref<1x4x8x288xf32, #tpu.memory_space<vmem>>, vector<1x4x8x288xf32>
    %34 = vector.shape_cast %33 : vector<1x4x8x288xf32> to vector<4x8x288xf32>
    %35 = vector.shape_cast %32 : vector<4x8x288xf32> to vector<1x4x8x288xf32>
    tpu.vector_store %arg3[%c0_22, %c0_23, %c0_24, %c0_25], %35 {strides = array<i32>} : memref<1x4x8x288xf32, #tpu.memory_space<vmem>>, vector<1x4x8x288xf32>,
    return
  }
  func.func @transform_0(%arg0: i32) -> (i32, i32, i32) {
    %c0_i32 = arith.constant 0 : i32
    %c0_i32_0 = arith.constant 0 : i32
    %c0_i32_1 = arith.constant 0 : i32
    return %arg0, %c0_i32, %c0_i32_0 : i32, i32, i32
  }
  func.func @transform_1(%arg0: i32) -> (i32, i32) {
    %c0_i32 = arith.constant 0 : i32
    %c0_i32_0 = arith.constant 0 : i32
    %c0_i32_1 = arith.constant 0 : i32
    return %c0_i32, %c0_i32_0 : i32, i32
  }
  func.func @transform_2(%arg0: i32) -> (i32, i32, i32, i32) {
    %c0_i32 = arith.constant 0 : i32
    %c0_i32_0 = arith.constant 0 : i32
    %c0_i32_1 = arith.constant 0 : i32
    %c0_i32_2 = arith.constant 0 : i32
    return %arg0, %c0_i32, %c0_i32_0, %c0_i32_1 : i32, i32, i32, i32
  }
}

</mosaic_0001>

<bundles_post_ra>
// kernel: up_conv_forward.1
= control target key start
LH: loop header
LB: loop body
LE: loop exit
PB: predicated region body
PF: predicated region fallthrough
CT: control target
= control target key end

     0   :  { %s652_s9 = smov 0   ;;  %s764_s0 = inlined_call_operand.vmem [shape: f32[2,4,342], index: 0, kind: input, shape index: {}]   ;;  %s765_s1 = inlined_call_operand.vmem [shape: f32[32,40], index: 1, kind: input, shape index: {}]   ;;  %s766_s2 = inlined_call_operand.vmem [shape: f32[2,4,8,288], index: 2, kind: output, shape index: {}]  }
   0x1 LB: > { %s568_s10 = sadd.s32 4294967295, %s625_s9   ;;  %p572_p0 = scmp.ge.s32.totalorder %s625_s9, 1  ;;  %s625_s9 = sphi %s652_s9, %s12_s9  }
   0x2   : > { %p112_p1 = scmp.lt.s32.totalorder %s625_s9, 3 }
   0x4   : > { %p113_p2 = pnand %p572_p0, %p112_p1 }
   0x5   : > { %p134_p3 = scmp.lt.s32.totalorder (!%p113_p2), %s568_s10, 1  ;;  %s627_s15 = smov (!%p113_p2), 127  }
   0x6   : > { %116 = sbr.rel (%p113_p2) target bundleno = 392 (0x188), region = 28  ;;  %s628_s16 = smov (!%p113_p2), 126  }
   0x7   : > { %s629_s17 = smov (!%p113_p2), 110   ;;  %s630_s18 = smov (!%p113_p2), 109  }
   0x8   : > { %s631_s19 = smov (!%p113_p2), 108   ;;  %s632_s20 = smov (!%p113_p2), 92  }
   0x9   : > { %s633_s21 = smov (!%p113_p2), 91   ;;  %s634_s22 = smov (!%p113_p2), 90  }
   0xb   : > { %s768_s10 = smov (!%p134_p3, %s568_s10), 1  ;;  %vm159_vm0 = vcmask 257024   ;;  %vm182_vm1 = vcmask 261124   ;;  %vm261_vm2 = vcmask 883712   ;;  %vm239_vm3 = vcmask 891904  }
   0xc   : > { %s599_s11 = smul.u32 12, %s768_s10  ;;  %v334_v41 = vlaneseq  ;;  %vm343_vm5 = vcmask 261125   ;;  %v635_v42 = vmov 1.0   ;;  %v636_v43 = vmov 0.0  }
   0xd   : > { %344 = vst.msk [vmem:[#allocation2 + $0x70] sm:$0xe0] %vm343_vm5, %v636_v43  ;;  %vm282_vm6 = vcmask 752640   ;;  %vm174_vm7 = vcmask 1039360   ;;  %vm304_vm8 = vcmask 744448   ;;  %vm325_vm9 = vcmask 736256  }
   0xe   : > { %s138_s14 = scalar_lea.vmem %s764_s0, %s599_s11  ;;  %vm336_vm4 = vcmp.lt.s32.totalorder %v334_v41, 288  ;;  %341 = vst [vmem:[#allocation2 + $0x60] sm:$0xe0] %v636_v43  ;;  %vm196_vm10 = vcmask 1031168   ;;  %vm218_vm11 = vcmask 900096   ;;  %vm364_vm12 = vcmask 326656  }
   0xf   : > { %v145_v0 = vld [vmem:[%s138_s14 + $0x8] sm:$0xf]  ;;  %v666_v1 = vld [vmem:[%s138_s14] sm:$0xff]  ;;  %339 = vst.msk [vmem:[#allocation2 + $0x64] ss:$8 sm:$0x7] %vm336_vm4, %v635_v42 }
  0x10   : > { %150 = vst [vmem:[#allocation1 + $0x10] ss:$2 sm:$0xff] %v145_v0  ;;  %s600_s3 = smul.u32 96, %s768_s10  ;;  %vm502_vm14 = vcmask 261120  }
  0x11   : > { %148 = vst [vmem:[#allocation1] ss:$2 sm:$0xff] %v666_v1 }
  0x12   : > { %342 = vst [vmem:[#allocation2 + $0x68] sm:$0xe0] %v636_v43  ;;  %s743_s6 = scalar_lea.vmem %s766_s2, %s600_s3 }
  0x17   : > { %v669_v2 = vld.sshfl [vmem:[#allocation1 + $0x10] sm:$0xff pattern:$0x75316420] }
  0x18   : > { %164 = vst [vmem:[#allocation1 + $0x11] ss:$2 sm:$0xff] %v145_v0  ;;  %v151_v3 = vld.sshfl [vmem:[#allocation1] sm:$0xff pattern:$0x75316420] }
  0x19   : > { %v152_v4 = vld.sshfl [vmem:[#allocation1 + $0x8] sm:$0xff pattern:$0x75316420]  ;;  %157 = vst [vmem:[#allocation2] sm:$0xf] %v151_v3 }
  0x1a   : > { %162 = vst [vmem:[#allocation1 + $0x1] ss:$2 sm:$0xff] %v666_v1 }
  0x1b   : > { %158 = vst [vmem:[#allocation2 + $0x8] sm:$0xf] %v152_v4 }
  0x1c   : > { %160 = vst.msk [vmem:[#allocation2 + $0x10] sm:$0xf] %vm159_vm0, %v669_v2 }
  0x1f   : > { %v167_v5 = vld.sshfl [vmem:[#allocation1 + $0x10] sm:$0xff pattern:$0x75316420] }
  0x20   : > { %172 = vrot.lane.b32.xlu0 %v167_v5, %s627_s15  ;;  %186 = vst [vmem:[#allocation1 + $0x10] ss:$2 sm:$0xff] %v145_v0 }
  0x21   : > { %v673_v6 = vld.sshfl [vmem:[#allocation1] sm:$0xff pattern:$0x75316420]  ;;  %v166_v7 = vld.sshfl [vmem:[#allocation1 + $0x8] sm:$0xff pattern:$0x75316420] }
  0x22   : > { %184 = vst [vmem:[#allocation1] ss:$2 sm:$0xff] %v666_v1 }
  0x27   : > { %v189_v8 = vld.sshfl [vmem:[#allocation1 + $0x10] sm:$0xff pattern:$0x75316420] }
  0x28   : > { %194 = vrot.lane.b32.xlu2 %v189_v8, %s628_s16  ;;  %208 = vst [vmem:[#allocation1 + $0x11] ss:$2 sm:$0xff] %v145_v0 }
  0x29   : > { %v187_v9 = vld.sshfl [vmem:[#allocation1] sm:$0xff pattern:$0x75316420]  ;;  %v188_v10 = vld.sshfl [vmem:[#allocation1 + $0x8] sm:$0xff pattern:$0x75316420] }
  0x2a   : > { %206 = vst [vmem:[#allocation1 + $0x1] ss:$2 sm:$0xff] %v666_v1 }
  0x2f   : > { %v211_v11 = vld.sshfl [vmem:[#allocation1 + $0x10] sm:$0xff pattern:$0x75316420] }
  0x30   : > { %216 = vrot.lane.b32.xlu0 %v211_v11, %s629_s17  ;;  %229 = vst [vmem:[#allocation1 + $0x10] ss:$2 sm:$0xff] %v145_v0 }
  0x31   : > { %v209_v12 = vld.sshfl [vmem:[#allocation1] sm:$0xff pattern:$0x75316420]  ;;  %v210_v13 = vld.sshfl [vmem:[#allocation1 + $0x8] sm:$0xff pattern:$0x75316420] }
  0x32   : > { %227 = vst [vmem:[#allocation1] ss:$2 sm:$0xff] %v666_v1 }
  0x37   : > { %v232_v14 = vld.sshfl [vmem:[#allocation1 + $0x10] sm:$0xff pattern:$0x75316420] }
  0x38   : > { %237 = vrot.lane.b32.xlu1 %v232_v14, %s630_s18  ;;  %251 = vst [vmem:[#allocation1 + $0x11] ss:$2 sm:$0xff] %v145_v0 }
  0x39   : > { %v231_v15 = vld.sshfl [vmem:[#allocation1 + $0x8] sm:$0xff pattern:$0x75316420]  ;;  %v230_v16 = vld.sshfl [vmem:[#allocation1] sm:$0xff pattern:$0x75316420] }
  0x3a   : > { %235 = vrot.lane.b32.xlu0 %v231_v15, %s630_s18  ;;  %233 = vrot.lane.b32.xlu2 %v230_v16, %s630_s18  ;;  %249 = vst [vmem:[#allocation1 + $0x1] ss:$2 sm:$0xff] %v666_v1 }
  0x3f   : > { %v254_v17 = vld.sshfl [vmem:[#allocation1 + $0x10] sm:$0xff pattern:$0x75316420] }
  0x40   : > { %272 = vst [vmem:[#allocation1 + $0x10] ss:$2 sm:$0xff] %v145_v0 }
  0x41   : > { %v252_v18 = vld.sshfl [vmem:[#allocation1] sm:$0xff pattern:$0x75316420]  ;;  %v253_v19 = vld.sshfl [vmem:[#allocation1 + $0x8] sm:$0xff pattern:$0x75316420] }
  0x42   : > { %259 = vrot.lane.b32.xlu2 %v254_v17, %s631_s19  ;;  %255 = vrot.lane.b32.xlu1 %v252_v18, %s631_s19  ;;  %270 = vst [vmem:[#allocation1] ss:$2 sm:$0xff] %v666_v1 }
  0x47   : > { %v275_v20 = vld.sshfl [vmem:[#allocation1 + $0x10] sm:$0xff pattern:$0x75316420] }
  0x48   : > { %294 = vst [vmem:[#allocation1 + $0x11] ss:$2 sm:$0xff] %v145_v0  ;;  %280 = vrot.lane.b32.xlu0 %v275_v20, %s632_s20  ;;  %v346_v20 = vld [vmem:[%s765_s1 + $0x8] sm:$0xff] }
  0x49   : > { %v273_v21 = vld.sshfl [vmem:[#allocation1] sm:$0xff pattern:$0x75316420]  ;;  %v274_v22 = vld.sshfl [vmem:[#allocation1 + $0x8] sm:$0xff pattern:$0x75316420] }
  0x4a   : > { %257 = vrot.lane.b32.xlu2 %v253_v19, %s631_s19  ;;  %276 = vrot.lane.b32.xlu1 %v273_v21, %s632_s20  ;;  %292 = vst [vmem:[#allocation1 + $0x1] ss:$2 sm:$0xff] %v666_v1 }
  0x4f   : > { %v297_v23 = vld.sshfl [vmem:[#allocation1 + $0x10] sm:$0xff pattern:$0x75316420] }
  0x50   : > { %315 = vst [vmem:[#allocation1 + $0x10] ss:$2 sm:$0xff] %v145_v0 }
  0x51   : > { %v295_v24 = vld.sshfl [vmem:[#allocation1] sm:$0xff pattern:$0x75316420]  ;;  %v296_v25 = vld.sshfl [vmem:[#allocation1 + $0x8] sm:$0xff pattern:$0x75316420] }
  0x52   : > { %278 = vrot.lane.b32.xlu2 %v274_v22, %s632_s20  ;;  %302 = vrot.lane.b32.xlu1 %v297_v23, %s633_s21  ;;  %313 = vst [vmem:[#allocation1] ss:$2 sm:$0xff] %v666_v1 }
  0x53   : > { %298 = vrot.lane.b32.xlu0 %v295_v24, %s633_s21 }
  0x57   : > { %v318_v26 = vld.sshfl [vmem:[#allocation1 + $0x10] sm:$0xff pattern:$0x75316420] }
  0x59   : > { %v317_v27 = vld.sshfl [vmem:[#allocation1 + $0x8] sm:$0xff pattern:$0x75316420]  ;;  %v316_v28 = vld.sshfl [vmem:[#allocation1] sm:$0xff pattern:$0x75316420] }
  0x5a   : > { %212 = vrot.lane.b32.xlu2 %v209_v12, %s629_s17  ;;  %300 = vrot.lane.b32.xlu1 %v296_v25, %s633_s21  ;;  %v347_v25 = vld [vmem:[%s765_s1 + $0x10] sm:$0xff] }
  0x5b   : > { %323 = vrot.lane.b32.xlu0 %v318_v26, %s634_s22  ;;  %v348_v26 = vld [vmem:[%s765_s1 + $0x18] sm:$0xff] }
  0x62   : > { %192 = vrot.lane.b32.xlu1 %v188_v10, %s628_s16  ;;  %321 = vrot.lane.b32.xlu2 %v317_v27, %s634_s22 }
  0x63   : > { %190 = vrot.lane.b32.xlu0 %v187_v9, %s628_s16 }
  0x6a   : > { %170 = vrot.lane.b32.xlu2 %v166_v7, %s627_s15  ;;  %319 = vrot.lane.b32.xlu1 %v316_v28, %s634_s22 }
  0x6b   : > { %214 = vrot.lane.b32.xlu0 %v210_v13, %s629_s17  ;;  %v345_v13 = vld [vmem:[%s765_s1] sm:$0xff] }
  0x72   : > { %168 = vrot.lane.b32.xlu1 %v673_v6, %s627_s15 }
  0x82   : > { %v693_v29 = vpop.permute.xlu2 %194 }
  0x83   : > { %204 = vst.msk [vmem:[#allocation2 + $0x28] sm:$0xf] %vm159_vm0, %v693_v29 }
  0x92   : > { %v173_v30 = vpop.permute.xlu0 %172 }
  0x93   : > { %183 = vst.msk [vmem:[#allocation2 + $0x10] sm:$0xf0] %vm182_vm1, %v173_v30 }
  0x94   : > { %v234_v31 = vpop.permute.xlu2 %233 }
  0x9a   : > { %v351_v14 = vld [vmem:[#allocation2 + $0x10] sm:$0xff] }
  0x9c   : > { %v260_v32 = vpop.permute.xlu2 %259 }
  0x9d   : > { %269 = vst.msk [vmem:[#allocation2 + $0x40] sm:$0xf0] %vm182_vm1, %v260_v32 }
  0xa2   : > { %v699_v33 = vpop.permute.xlu0 %216 }
  0xa3   : > { %226 = vst.msk [vmem:[#allocation2 + $0x28] sm:$0xf0] %vm182_vm1, %v699_v33 }
  0xa4   : > { %v258_v34 = vpop.permute.xlu2 %257 }
  0xa5   : > { %v263_v35 = vsel %vm261_vm2, %v258_v34, %v260_v32 }
  0xa6   : > { %268 = vst [vmem:[#allocation2 + $0x38] sm:$0xf0] %v263_v35 }
  0xaa   : > { %v238_v36 = vpop.permute.xlu1 %237  ;;  %v354_v10 = vld [vmem:[#allocation2 + $0x28] sm:$0xff] }
  0xab   : > { %247 = vst.msk [vmem:[#allocation2 + $0x40] sm:$0xf] %vm159_vm0, %v238_v36 }
  0xac   : > { %v236_v37 = vpop.permute.xlu0 %235  ;;  %v279_v38 = vpop.permute.xlu2 %278 }
  0xad   : > { %v240_v39 = vsel %vm239_vm3, %v234_v31, %v236_v37  ;;  %v241_v40 = vsel %vm239_vm3, %v236_v37, %v238_v36 }
  0xae   : > { %245 = vst [vmem:[#allocation2 + $0x30] sm:$0xf] %v240_v39 }
  0xaf   : > { %246 = vst [vmem:[#allocation2 + $0x38] sm:$0xf] %v241_v40 }
  0xb2   : > { %v357_v6 = vld [vmem:[#allocation2 + $0x40] sm:$0xff] }
  0xb4   : > { %v256_v44 = vpop.permute.xlu1 %255  ;;  %v213_v45 = vpop.permute.xlu2 %212 }
  0xb5   : > { %v262_v46 = vsel %vm261_vm2, %v256_v44, %v258_v34 }
  0xb6   : > { %267 = vst [vmem:[#allocation2 + $0x30] sm:$0xf0] %v262_v46  ;;  %v356_v5 = vld [vmem:[#allocation2 + $0x38] sm:$0xff] }
  0xba   : > { %v281_v47 = vpop.permute.xlu0 %280 }
  0xbb   : > { %v284_v48 = vsel %vm282_vm6, %v279_v38, %v281_v47  ;;  %290 = vst.msk [vmem:[#allocation2 + $0x58] sm:$0xf] %vm159_vm0, %v281_v47 }
  0xbc   : > { %289 = vst [vmem:[#allocation2 + $0x50] sm:$0xf] %v284_v48  ;;  %v277_v49 = vpop.permute.xlu1 %276  ;;  %v322_v50 = vpop.permute.xlu2 %321 }
  0xbd   : > { %v283_v51 = vsel %vm282_vm6, %v277_v49, %v279_v38  ;;  %v355_v22 = vld [vmem:[#allocation2 + $0x30] sm:$0xff] }
  0xbe   : > { %288 = vst [vmem:[#allocation2 + $0x48] sm:$0xf] %v283_v51 }
  0xc4   : > { %v303_v52 = vpop.permute.xlu1 %302  ;;  %v171_v53 = vpop.permute.xlu2 %170 }
  0xc5   : > { %312 = vst.msk [vmem:[#allocation2 + $0x58] sm:$0xf0] %vm182_vm1, %v303_v52  ;;  %v299_v54 = vpop.permute.xlu0 %298  ;;  %v176_v55 = vsel %vm174_vm7, %v171_v53, %v173_v30 }
  0xc6   : > { %181 = vst [vmem:[#allocation2 + $0x8] sm:$0xf0] %v176_v55 }
  0xcc   : > { %v301_v56 = vpop.permute.xlu1 %300  ;;  %v360_v4 = vld [vmem:[#allocation2 + $0x58] sm:$0xff] }
  0xcd   : > { %v305_v57 = vsel %vm304_vm8, %v299_v54, %v301_v56  ;;  %v306_v58 = vsel %vm304_vm8, %v301_v56, %v303_v52  ;;  %v324_v59 = vpop.permute.xlu0 %323  ;;  %v350_v21 = vld [vmem:[#allocation2 + $0x8] sm:$0xff] }
  0xce   : > { %310 = vst [vmem:[#allocation2 + $0x48] sm:$0xf0] %v305_v57  ;;  %v327_v60 = vsel %vm325_vm9, %v322_v50, %v324_v59 }
  0xcf   : > { %311 = vst [vmem:[#allocation2 + $0x50] sm:$0xf0] %v306_v58 }
  0xd0   : > { %332 = vst [vmem:[#allocation2 + $0x68] sm:$0xf] %v327_v60 }
  0xd1   : > { %333 = vst.msk [vmem:[#allocation2 + $0x70] sm:$0xf] %vm159_vm0, %v324_v59 }
  0xd4   : > { %v193_v61 = vpop.permute.xlu1 %192 }
  0xd5   : > { %v198_v62 = vsel %vm196_vm10, %v193_v61, %v693_v29  ;;  %v191_v63 = vpop.permute.xlu0 %190  ;;  %v358_v19 = vld [vmem:[#allocation2 + $0x48] sm:$0xff] }
  0xd6   : > { %203 = vst [vmem:[#allocation2 + $0x20] sm:$0xf] %v198_v62  ;;  %v197_v0 = vsel %vm196_vm10, %v191_v63, %v193_v61  ;;  %v359_v3 = vld [vmem:[#allocation2 + $0x50] sm:$0xff] }
  0xd7   : > { %202 = vst [vmem:[#allocation2 + $0x18] sm:$0xf] %v197_v0  ;;  %v362_v1 = vld [vmem:[#allocation2 + $0x68] sm:$0xff] }
  0xd8   : > { %v363_v2 = vld [vmem:[#allocation2 + $0x70] sm:$0xff]  ;;  %594 = vmatpush.msra.mxu1 %v362_v1 }
  0xd9   : > { %446 = vmatpush.msra.mxu2 %v363_v2 }
  0xda   : > { %595 = vmatpush.msra.mxu1 %v359_v3 }
  0xdb   : > { %447 = vmatpush.msra.mxu2 %v360_v4 }
  0xdc   : > { %596 = vmatpush.msra.mxu1 %v356_v5  ;;  %v320_v7 = vpop.permute.xlu1 %319 }
  0xdd   : > { %448 = vmatpush.msra.mxu2 %v357_v6  ;;  %v215_v8 = vpop.permute.xlu0 %214  ;;  %v326_v9 = vsel %vm325_vm9, %v320_v7, %v322_v50 }
  0xde   : > { %v219_v11 = vsel %vm218_vm11, %v213_v45, %v215_v8  ;;  %v220_v12 = vsel %vm218_vm11, %v215_v8, %v699_v33  ;;  %331 = vst [vmem:[#allocation2 + $0x60] sm:$0xf] %v326_v9 }
  0xdf   : > { %449 = vmatpush.msra.mxu2 %v354_v10  ;;  %224 = vst [vmem:[#allocation2 + $0x18] sm:$0xf0] %v219_v11 }
  0xe0   : > { %225 = vst [vmem:[#allocation2 + $0x20] sm:$0xf0] %v220_v12 }
  0xe1   : > { %450 = vmatpush.msra.mxu2 %v351_v14 }
  0xe2   : > { %583 = vmatmul.msk.f32.vlgmr.msra.gmra.mxu2 %vm364_vm12, %v345_v13 }
  0xe4   : > { %v169_v15 = vpop.permute.xlu1 %168 }
  0xe5   : > { %v175_v16 = vsel %vm174_vm7, %v169_v15, %v171_v53  ;;  %v361_v17 = vld [vmem:[#allocation2 + $0x60] sm:$0xff] }
  0xe6   : > { %180 = vst [vmem:[#allocation2] sm:$0xf0] %v175_v16  ;;  %388 = vmatpush.msra.mxu0 %v361_v17  ;;  %589 = vmatpush.msra.mxu3 %v361_v17  ;;  %v352_v23 = vld [vmem:[#allocation2 + $0x18] sm:$0xff] }
  0xe7   : > { %v353_v18 = vld [vmem:[#allocation2 + $0x20] sm:$0xff] }
  0xe8   : > { %597 = vmatpush.msra.mxu1 %v353_v18  ;;  %389 = vmatpush.msra.mxu0 %v358_v19 }
  0xe9   : > { %590 = vmatpush.msra.mxu3 %v358_v19 }
  0xea   : > { %598 = vmatpush.msra.mxu1 %v350_v21  ;;  %390 = vmatpush.msra.mxu0 %v355_v22 }
  0xeb   : > { %591 = vmatpush.msra.mxu3 %v355_v22  ;;  %584 = vmatmul.msk.f32.gmra.mxu2 %vm364_vm12, %v346_v20 }
  0xec   : > { %391 = vmatpush.msra.mxu0 %v352_v23  ;;  %580 = vmatmul.msk.f32.vlgmr.msra.gmra.mxu1 %vm364_vm12, %v346_v20 }
  0xed   : > { %592 = vmatpush.msra.mxu3 %v352_v23  ;;  %v349_v24 = vld [vmem:[#allocation2] sm:$0xff] }
  0xee   : > { %392 = vmatpush.msra.mxu0 %v349_v24 }
  0xef   : > { %593 = vmatpush.msra.mxu3 %v349_v24  ;;  %575 = vmatmul.msk.f32.vlgmr.msra.gmra.mxu0 %vm364_vm12, %v345_v13 }
  0xf0   : > { %417 = vmatpush.msrb.mxu0 %v362_v1  ;;  %576 = vmatmul.msk.f32.vlgmr.msra.gmra.mxu3 %vm364_vm12, %v346_v20 }
  0xf2   : > { %418 = vmatpush.msrb.mxu0 %v359_v3 }
  0xf3   : > { %585 = vmatmul.msk.f32.gmra.mxu2 %vm364_vm12, %v347_v25 }
  0xf4   : > { %419 = vmatpush.msrb.mxu0 %v356_v5  ;;  %581 = vmatmul.msk.f32.gmra.mxu1 %vm364_vm12, %v347_v25 }
  0xf6   : > { %420 = vmatpush.msrb.mxu0 %v353_v18 }
  0xf8   : > { %421 = vmatpush.msrb.mxu0 %v350_v21  ;;  %577 = vmatmul.msk.f32.gmra.mxu3 %vm364_vm12, %v347_v25 }
  0xf9   : > { %579 = vmatmul.msk.f32.vlgmr.msrb.gmra.mxu0 %vm364_vm12, %v345_v13 }
  0xfb   : > { %586 = vmatmul.msk.f32.gmra.mxu2 %vm364_vm12, %v348_v26 }
  0xfc   : > { %582 = vmatmul.msk.f32.gmra.mxu1 %vm364_vm12, %v348_v26 }
 0x100   : > { %578 = vmatmul.msk.f32.gmra.mxu3 %vm364_vm12, %v348_v26 }
 0x165   : > { %v452_v27 = vpop.f32.mrf.mxu2 }
 0x166   : > { %vm466_vm13 = vcmp.ge.f32.partialorder %v452_v27, 0.0  ;;  %v478_v28 = vmul.f32 0.01, %v452_v27 }
 0x168   : > { %v490_v29 = vsel %vm466_vm13, %v452_v27, %v478_v28 }
 0x169   : > { %503 = vst.msk [vmem:[%s743_s6 + $0x10] sm:$0xff] %vm502_vm14, %v490_v29  ;;  %v426_v30 = vpop.f32.mrf.mxu1 }
 0x16a   : > { %vm468_vm15 = vcmp.ge.f32.partialorder %v426_v30, 0.0  ;;  %v480_v31 = vmul.f32 0.01, %v426_v30 }
 0x16c   : > { %v492_v32 = vsel %vm468_vm15, %v426_v30, %v480_v31  ;;  %v394_v33 = vpop.f32.mrf.mxu0 }
 0x16d   : > { %505 = vst [vmem:[%s743_s6 + $0x20] sm:$0xff] %v492_v32  ;;  %vm464_vm0 = vcmp.ge.f32.partialorder %v394_v33, 0.0  ;;  %v476_v35 = vmul.f32 0.01, %v394_v33 }
 0x16e   : > { %v455_v34 = vpop.f32.mrf.mxu2 }
 0x16f   : > { %vm469_vm1 = vcmp.ge.f32.partialorder %v455_v34, 0.0  ;;  %v481_v36 = vmul.f32 0.01, %v455_v34  ;;  %v488_v37 = vsel %vm464_vm0, %v394_v33, %v476_v35 }
 0x170   : > { %500 = vst [vmem:[%s743_s6] sm:$0xff] %v488_v37 }
 0x171   : > { %v493_v38 = vsel %vm469_vm1, %v455_v34, %v481_v36  ;;  %v429_v39 = vpop.f32.mrf.mxu1 }
 0x172   : > { %506 = vst.msk [vmem:[%s743_s6 + $0x28] sm:$0xff] %vm502_vm14, %v493_v38  ;;  %vm471_vm2 = vcmp.ge.f32.partialorder %v429_v39, 0.0  ;;  %v483_v40 = vmul.f32 0.01, %v429_v39 }
 0x173   : > { %v397_v41 = vpop.f32.mrf.mxu3 }
 0x174   : > { %vm467_vm3 = vcmp.ge.f32.partialorder %v397_v41, 0.0  ;;  %v479_v42 = vmul.f32 0.01, %v397_v41  ;;  %v495_v43 = vsel %vm471_vm2, %v429_v39, %v483_v40 }
 0x175   : > { %508 = vst [vmem:[%s743_s6 + $0x38] sm:$0xff] %v495_v43 }
 0x176   : > { %v423_v44 = vpop.f32.mrf.mxu0  ;;  %v491_v45 = vsel %vm467_vm3, %v397_v41, %v479_v42  ;;  %v458_v46 = vpop.f32.mrf.mxu2 }
 0x177   : > { %vm465_vm4 = vcmp.ge.f32.partialorder %v423_v44, 0.0  ;;  %v477_v47 = vmul.f32 0.01, %v423_v44  ;;  %504 = vst [vmem:[%s743_s6 + $0x18] sm:$0xff] %v491_v45  ;;  %vm472_vm5 = vcmp.ge.f32.partialorder %v458_v46, 0.0 }
 0x178   : > { %v484_v48 = vmul.f32 0.01, %v458_v46 }
 0x179   : > { %v489_v49 = vsel %vm465_vm4, %v423_v44, %v477_v47  ;;  %v432_v51 = vpop.f32.mrf.mxu1 }
 0x17a   : > { %v496_v50 = vsel %vm472_vm5, %v458_v46, %v484_v48  ;;  %501 = vst [vmem:[%s743_s6 + $0x8] sm:$0xff] %v489_v49  ;;  %vm474_vm6 = vcmp.ge.f32.partialorder %v432_v51, 0.0  ;;  %v486_v52 = vmul.f32 0.01, %v432_v51 }
 0x17b   : > { %509 = vst.msk [vmem:[%s743_s6 + $0x40] sm:$0xff] %vm502_vm14, %v496_v50  ;;  %v400_v53 = vpop.f32.mrf.mxu3 }
 0x17c   : > { %vm470_vm7 = vcmp.ge.f32.partialorder %v400_v53, 0.0  ;;  %v482_v54 = vmul.f32 0.01, %v400_v53  ;;  %v498_v55 = vsel %vm474_vm6, %v432_v51, %v486_v52 }
 0x17d   : > { %511 = vst [vmem:[%s743_s6 + $0x50] sm:$0xff] %v498_v55 }
 0x17e   : > { %v494_v56 = vsel %vm470_vm7, %v400_v53, %v482_v54  ;;  %v461_v57 = vpop.f32.mrf.mxu2 }
 0x17f   : > { %507 = vst [vmem:[%s743_s6 + $0x30] sm:$0xff] %v494_v56  ;;  %vm475_vm8 = vcmp.ge.f32.partialorder %v461_v57, 0.0  ;;  %v487_v58 = vmul.f32 0.01, %v461_v57 }
 0x181   : > { %v499_v59 = vsel %vm475_vm8, %v461_v57, %v487_v58 }
 0x182   : > { %512 = vst.msk [vmem:[%s743_s6 + $0x58] sm:$0xff] %vm502_vm14, %v499_v59 }
 0x183   : > { %v403_v60 = vpop.f32.mrf.mxu3 }
 0x184   : > { %vm473_vm9 = vcmp.ge.f32.partialorder %v403_v60, 0.0  ;;  %v485_v61 = vmul.f32 0.01, %v403_v60 }
 0x186   : > { %v497_v62 = vsel %vm473_vm9, %v403_v60, %v485_v61 }
 0x187   : > { %510 = vst [vmem:[%s743_s6 + $0x48] sm:$0xff] %v497_v62 }
 0x188 PF: > { %s12_s9 = sadd.s32 1, %s625_s9  }
 0x189   : > { %p9_p4 = scmp.ge.s32.totalorder %s12_s9, 4  }
 0x18b   :  { %11 = sbr.rel (!%p9_p4) target bundleno = 1 (0x1), region = 72 }

</bundles_post_ra>
